<compile_context>
chip_gen: v6e
topology: v6e:2x2x1
jax: 0.10.0
libtpu: 0.0.40
codegen_flags: <defaults>
</compile_context>

<pallas_src>
import functools

import numpy as np
import jax
import jax.numpy as jnp
from jax.experimental import pallas as pl
from jax.experimental.pallas import tpu as pltpu


def _round_up(x, m):
    return (x + m - 1) // m * m


# -----------------------------------------------------------------------------
# Kernel: one batch tile per grid step; both heads computed inside the body.
#   xy_ref   : (TB, K1p)     bf16   concatenated [x, y], cols zero-padded
#   w1_ref   : (K1p, 512)    bf16   layer-1 weights of both heads, side by side
#   wt_ref   : (2, 512, 128) bf16   per-head packed layers 2..6 (rows 256/128/64/32/32)
#   aux1_ref : (8, 512)      f32    row 0 = layer-1 biases, row 1 = layer-1 alphas
#   auxt_ref : (2, 16, 128)  f32    rows 0..4 = biases L2..L6, rows 5..8 = alphas L2..L5
#   o_ref    : (TB, 256)     f32    lanes 0..127 = mu, lanes 128..255 = log_sigma^2
# -----------------------------------------------------------------------------
def _encoder_kernel(xy_ref, w1_ref, wt_ref, aux1_ref, auxt_ref, o_ref):
    aux1 = aux1_ref[...]                                    # (8, 512)
    xy = xy_ref[...]                                        # (TB, K1p) bf16

    # Layer 1 for both heads in one MXU push.
    h = (jnp.dot(xy, w1_ref[...], preferred_element_type=jnp.float32)
         + aux1[0:1, :])
    h = jnp.where(h > 0, h, aux1[1:2, :] * h)               # PReLU (per-head alpha)
    # Dropout(0.9)/(0.8)/(0.5) are identity in eval mode.

    ks = (256, 128, 64, 32, 32)                             # true K of layers 2..6
    for head in range(2):
        wth = wt_ref.at[head]                               # (512, 128) ref view
        aux = auxt_ref[head]                                # (16, 128)
        hh = h[:, head * 256:(head + 1) * 256]              # (TB, 256) f32
        r = 0
        for li, k in enumerate(ks):
            lhs = hh if hh.shape[1] == k else hh[:, :k]     # valid cols only
            hh = (jnp.dot(lhs.astype(jnp.bfloat16), wth[pl.ds(r, k), :],
                          preferred_element_type=jnp.float32)
                  + aux[li:li + 1, :])
            if li < 4:                                      # PReLU after L2..L5 only
                hh = jnp.where(hh > 0, hh, aux[5 + li:6 + li, :] * hh)
            r += k
        o_ref[:, head * 128:(head + 1) * 128] = hh.astype(o_ref.dtype)


def _encoder_forward(x, y, w1, wt, aux1, auxt, *, k1p, latent):
    B = x.shape[0]
    k1 = x.shape[1] + y.shape[1]

    xy = jnp.concatenate([x.astype(jnp.bfloat16), y.astype(jnp.bfloat16)], axis=1)

    # Batch tiling: up to 512 rows/tile, sized so the last tile is not mostly pad.
    nb = -(-B // 512)
    tb = _round_up(-(-B // nb), 8)
    b_pad = nb * tb
    if b_pad != B or k1p != k1:
        xy = jnp.pad(xy, ((0, b_pad - B), (0, k1p - k1)))

    out = pl.pallas_call(
        _encoder_kernel,
        out_shape=jax.ShapeDtypeStruct((b_pad, 256), jnp.float32),
        grid=(nb,),
        in_specs=[
            pl.BlockSpec((tb, k1p), lambda b: (b, 0)),
            pl.BlockSpec((k1p, 512), lambda b: (0, 0)),
            pl.BlockSpec((2, 512, 128), lambda b: (0, 0, 0)),
            pl.BlockSpec((8, 512), lambda b: (0, 0)),
            pl.BlockSpec((2, 16, 128), lambda b: (0, 0, 0)),
        ],
        out_specs=pl.BlockSpec((tb, 256), lambda b: (b, 0)),
        compiler_params=pltpu.CompilerParams(
            dimension_semantics=("parallel",)),
    )(xy, w1, wt, aux1, auxt)

    mu = out[:B, :latent]
    log_sigma_pow2 = out[:B, 128:128 + latent]
    return mu, log_sigma_pow2


# -----------------------------------------------------------------------------
# Parameter construction & packing (host side).
# Weights stored as [in, out] = torch_weight.T; torch nn.Linear default init.
# -----------------------------------------------------------------------------
def _init_head_params(key, input_size, cond_size, latent):
    dims = [input_size + cond_size, 256, 128, 64, 32, 32, latent]
    ws, bs = [], []
    keys = jax.random.split(key, 2 * (len(dims) - 1))
    for i in range(len(dims) - 1):
        fan_in, fan_out = dims[i], dims[i + 1]
        bound = 1.0 / float(np.sqrt(fan_in))
        w = jax.random.uniform(keys[2 * i], (fan_in, fan_out),
                               minval=-bound, maxval=bound, dtype=jnp.float32)
        b = jax.random.uniform(keys[2 * i + 1], (fan_out,),
                               minval=-bound, maxval=bound, dtype=jnp.float32)
        ws.append(np.asarray(w))
        bs.append(np.asarray(b))
    alphas = np.full((6,), 0.25, np.float32)      # nn.PReLU() default (5 used)
    return ws, bs, alphas


def _pack_params(raw_heads, input_size, cond_size):
    """Pack both heads into compact slabs (see kernel docstring for layout)."""
    k1 = input_size + cond_size
    k1p = _round_up(k1, 16)                       # bf16 sublane alignment
    w1 = np.zeros((k1p, 512), np.float32)
    aux1 = np.zeros((8, 512), np.float32)
    wt = np.zeros((2, 512, 128), np.float32)
    auxt = np.zeros((2, 16, 128), np.float32)
    for h, (ws, bs, alphas) in enumerate(raw_heads):
        w1[:k1, h * 256:(h + 1) * 256] = ws[0]
        aux1[0, h * 256:(h + 1) * 256] = bs[0]
        aux1[1, h * 256:(h + 1) * 256] = alphas[0]
        r = 0
        for li in range(1, 6):                    # layers 2..6
            w = ws[li]
            ri, ro = w.shape
            wt[h, r:r + ri, :ro] = w
            auxt[h, li - 1, :ro] = bs[li]
            if li < 5:                            # PReLU after layers 2..5 only
                auxt[h, 5 + (li - 1), :] = alphas[li]
            r += ri
    return (jnp.asarray(w1, jnp.bfloat16), jnp.asarray(wt, jnp.bfloat16),
            jnp.asarray(aux1, jnp.float32), jnp.asarray(auxt, jnp.float32), k1p)


class EncoderPallas:
    def __init__(self, input_size, cond_size, latent_size, key):
        assert latent_size <= 128
        self.input_size = input_size
        self.cond_size = cond_size
        self.latent_size = latent_size
        k_mu, k_ls = jax.random.split(key)
        self._raw = [_init_head_params(k, input_size, cond_size, latent_size)
                     for k in (k_mu, k_ls)]
        self.w1, self.wt, self.aux1, self.auxt, self.k1p = _pack_params(
            self._raw, input_size, cond_size)
        self._forward = jax.jit(functools.partial(
            _encoder_forward, k1p=self.k1p, latent=latent_size))

    def forward(self, x, y):
        return self._forward(x, y, self.w1, self.wt, self.aux1, self.auxt)


# -----------------------------------------------------------------------------
# Pure-JAX reference (same bf16 weights / f32 accumulation) for a sanity check.
# -----------------------------------------------------------------------------
def _ref_head(x, y, ws, bs, alphas):
    h = jnp.concatenate([x, y], axis=1)
    for i in range(6):
        w = jnp.asarray(ws[i], dtype=jnp.bfloat16)
        b = jnp.asarray(bs[i], dtype=jnp.float32)
        h = jnp.dot(h.astype(jnp.bfloat16), w,
                    preferred_element_type=jnp.float32) + b
        if i < 5:
            h = jnp.where(h > 0, h, jnp.float32(alphas[i]) * h)
    return h


if __name__ == "__main__":
    key = jax.random.PRNGKey(0)
    k_param, k_x, k_y = jax.random.split(key, 3)

    input_size, cond_size, latent_size = 16, 16, 8
    batch = 8

    enc = EncoderPallas(input_size, cond_size, latent_size, k_param)

    x = jax.random.normal(k_x, (batch, input_size), dtype=jnp.float32)
    y = jax.random.normal(k_y, (batch, cond_size), dtype=jnp.float32)

    mu, log_sigma_pow2 = enc.forward(x, y)
    jax.block_until_ready((mu, log_sigma_pow2))

    # correctness check against pure-JAX reference (same bf16 weights)
    mu_ref = _ref_head(x, y, *enc._raw[0])
    ls_ref = _ref_head(x, y, *enc._raw[1])
    assert mu.shape == (batch, latent_size)
    assert log_sigma_pow2.shape == (batch, latent_size)
    assert jnp.allclose(mu, mu_ref, atol=2e-3, rtol=2e-3), \
        float(jnp.max(jnp.abs(mu - mu_ref)))
    assert jnp.allclose(log_sigma_pow2, ls_ref, atol=2e-3, rtol=2e-3), \
        float(jnp.max(jnp.abs(log_sigma_pow2 - ls_ref)))

    print("KERNEL_OK")
</pallas_src>

<mosaic_0001>
module attributes {stable_mosaic.version = 11 : i64} {
  func.func @_encoder_kernel(%arg0: i32, %arg1: memref<8x32xbf16, #tpu.memory_space<vmem>>, %arg2: memref<32x512xbf16, #tpu.memory_space<vmem>>, %arg3: memref<2x512x128xbf16, #tpu.memory_space<vmem>>, %arg4: memref<8x512xf32, #tpu.memory_space<vmem>>, %arg5: memref<2x16x128xf32, #tpu.memory_space<vmem>>, %arg6: memref<8x256xf32, #tpu.memory_space<vmem>>) attributes {dimension_semantics = [#tpu.dimension_semantics<parallel>], iteration_bounds = array<i64: 1>, scalar_prefetch = 0 : i64, scratch_operands = 0 : i64, tpu.core_type = #tpu.core_type<tc>, window_params = [{transform_indices = @transform_0, window_bounds = array<i64: 8, 32>}, {pipeline_mode = #tpu.pipeline_mode<synchronous>, transform_indices = @transform_1, window_bounds = array<i64: 32, 512>}, {pipeline_mode = #tpu.pipeline_mode<synchronous>, transform_indices = @transform_2, window_bounds = array<i64: 2, 512, 128>}, {pipeline_mode = #tpu.pipeline_mode<synchronous>, transform_indices = @transform_3, window_bounds = array<i64: 8, 512>}, {pipeline_mode = #tpu.pipeline_mode<synchronous>, transform_indices = @transform_4, window_bounds = array<i64: 2, 16, 128>}, {transform_indices = @transform_5, window_bounds = array<i64: 8, 256>}]} {
    %c0 = arith.constant 0 : index
    %c0_0 = arith.constant 0 : index
    %0 = vector.load %arg4[%c0, %c0_0] : memref<8x512xf32, #tpu.memory_space<vmem>>, vector<8x512xf32>
    %c0_1 = arith.constant 0 : index
    %c0_2 = arith.constant 0 : index
    %1 = vector.load %arg1[%c0_1, %c0_2] : memref<8x32xbf16, #tpu.memory_space<vmem>>, vector<8x32xbf16>
    %c0_3 = arith.constant 0 : index
    %c0_4 = arith.constant 0 : index
    %2 = vector.load %arg2[%c0_3, %c0_4] : memref<32x512xbf16, #tpu.memory_space<vmem>>, vector<32x512xbf16>
    %cst = arith.constant dense<0.000000e+00> : vector<8x512xf32>
    %3 = tpu.matmul %1, %2, %cst {dimension_numbers = #tpu.dot_dimension_numbers<[1], [0], [0], [1], [0, 0, 1, 1], [], []>} : vector<8x32xbf16>, vector<32x512xbf16>, vector<8x512xf32> -> vector<8x512xf32>
    %4 = vector.extract_strided_slice %0 {offsets = [0, 0], sizes = [1, 512], strides = [1, 1]} : vector<8x512xf32> to vector<1x512xf32>
    %5 = vector.broadcast %4 : vector<1x512xf32> to vector<8x512xf32>
    %6 = arith.addf %3, %5 : vector<8x512xf32>
    %cst_5 = arith.constant 0.000000e+00 : f32
    %7 = vector.broadcast %cst_5 : f32 to vector<8x512xf32>
    %8 = arith.cmpf ogt, %6, %7 : vector<8x512xf32>
    %9 = vector.extract_strided_slice %0 {offsets = [1, 0], sizes = [1, 512], strides = [1, 1]} : vector<8x512xf32> to vector<1x512xf32>
    %10 = vector.broadcast %9 : vector<1x512xf32> to vector<8x512xf32>
    %11 = arith.mulf %10, %6 : vector<8x512xf32>
    %12 = arith.select %8, %6, %11 : vector<8x512xi1>, vector<8x512xf32>
    %c0_6 = arith.constant 0 : index
    %c0_7 = arith.constant 0 : index
    %c0_8 = arith.constant 0 : index
    %13 = vector.load %arg5[%c0_6, %c0_7, %c0_8] : memref<2x16x128xf32, #tpu.memory_space<vmem>>, vector<1x16x128xf32>
    %14 = vector.shape_cast %13 : vector<1x16x128xf32> to vector<16x128xf32>
    %15 = vector.extract_strided_slice %12 {offsets = [0, 0], sizes = [8, 256], strides = [1, 1]} : vector<8x512xf32> to vector<8x256xf32>
    %16 = arith.truncf %15 : vector<8x256xf32> to vector<8x256xbf16>
    %c0_i32 = arith.constant 0 : i32
    %c0_i32_9 = arith.constant 0 : i32
    %c0_i32_10 = arith.constant 0 : i32
    %17 = tpu.memref_slice %arg3[%c0_i32, %c0_i32_9, %c0_i32_10] : memref<2x512x128xbf16, #tpu.memory_space<vmem>> -> memref<1x512x128xbf16, #tpu.memory_space<vmem>>
    %18 = tpu.memref_squeeze %17 : memref<1x512x128xbf16, #tpu.memory_space<vmem>> -> memref<512x128xbf16, #tpu.memory_space<vmem>>
    %c0_11 = arith.constant 0 : index
    %c0_12 = arith.constant 0 : index
    %19 = vector.load %18[%c0_11, %c0_12] : memref<512x128xbf16, #tpu.memory_space<vmem>>, vector<256x128xbf16>
    %cst_13 = arith.constant dense<0.000000e+00> : vector<8x128xf32>
    %20 = tpu.matmul %16, %19, %cst_13 {dimension_numbers = #tpu.dot_dimension_numbers<[1], [0], [0], [1], [0, 0, 1, 1], [], []>} : vector<8x256xbf16>, vector<256x128xbf16>, vector<8x128xf32> -> vector<8x128xf32>
    %21 = vector.extract_strided_slice %14 {offsets = [0, 0], sizes = [1, 128], strides = [1, 1]} : vector<16x128xf32> to vector<1x128xf32>
    %22 = vector.broadcast %21 : vector<1x128xf32> to vector<8x128xf32>
    %23 = arith.addf %20, %22 : vector<8x128xf32>
    %cst_14 = arith.constant 0.000000e+00 : f32
    %24 = vector.broadcast %cst_14 : f32 to vector<8x128xf32>
    %25 = arith.cmpf ogt, %23, %24 : vector<8x128xf32>
    %26 = vector.extract_strided_slice %14 {offsets = [5, 0], sizes = [1, 128], strides = [1, 1]} : vector<16x128xf32> to vector<1x128xf32>
    %27 = vector.broadcast %26 : vector<1x128xf32> to vector<8x128xf32>
    %28 = arith.mulf %27, %23 : vector<8x128xf32>
    %29 = arith.select %25, %23, %28 : vector<8x128xi1>, vector<8x128xf32>
    %30 = arith.truncf %29 : vector<8x128xf32> to vector<8x128xbf16>
    %c0_i32_15 = arith.constant 0 : i32
    %c0_i32_16 = arith.constant 0 : i32
    %c0_i32_17 = arith.constant 0 : i32
    %31 = tpu.memref_slice %arg3[%c0_i32_15, %c0_i32_16, %c0_i32_17] : memref<2x512x128xbf16, #tpu.memory_space<vmem>> -> memref<1x512x128xbf16, #tpu.memory_space<vmem>>
    %32 = tpu.memref_squeeze %31 : memref<1x512x128xbf16, #tpu.memory_space<vmem>> -> memref<512x128xbf16, #tpu.memory_space<vmem>>
    %c256 = arith.constant 256 : index
    %c0_18 = arith.constant 0 : index
    %33 = vector.load %32[%c256, %c0_18] : memref<512x128xbf16, #tpu.memory_space<vmem>>, vector<128x128xbf16>
    %cst_19 = arith.constant dense<0.000000e+00> : vector<8x128xf32>
    %34 = tpu.matmul %30, %33, %cst_19 {dimension_numbers = #tpu.dot_dimension_numbers<[1], [0], [0], [1], [0, 0, 1, 1], [], []>} : vector<8x128xbf16>, vector<128x128xbf16>, vector<8x128xf32> -> vector<8x128xf32>
    %35 = vector.extract_strided_slice %14 {offsets = [1, 0], sizes = [1, 128], strides = [1, 1]} : vector<16x128xf32> to vector<1x128xf32>
    %36 = vector.broadcast %35 : vector<1x128xf32> to vector<8x128xf32>
    %37 = arith.addf %34, %36 : vector<8x128xf32>
    %cst_20 = arith.constant 0.000000e+00 : f32
    %38 = vector.broadcast %cst_20 : f32 to vector<8x128xf32>
    %39 = arith.cmpf ogt, %37, %38 : vector<8x128xf32>
    %40 = vector.extract_strided_slice %14 {offsets = [6, 0], sizes = [1, 128], strides = [1, 1]} : vector<16x128xf32> to vector<1x128xf32>
    %41 = vector.broadcast %40 : vector<1x128xf32> to vector<8x128xf32>
    %42 = arith.mulf %41, %37 : vector<8x128xf32>
    %43 = arith.select %39, %37, %42 : vector<8x128xi1>, vector<8x128xf32>
    %44 = vector.extract_strided_slice %43 {offsets = [0, 0], sizes = [8, 64], strides = [1, 1]} : vector<8x128xf32> to vector<8x64xf32>
    %45 = arith.truncf %44 : vector<8x64xf32> to vector<8x64xbf16>
    %c0_i32_21 = arith.constant 0 : i32
    %c0_i32_22 = arith.constant 0 : i32
    %c0_i32_23 = arith.constant 0 : i32
    %46 = tpu.memref_slice %arg3[%c0_i32_21, %c0_i32_22, %c0_i32_23] : memref<2x512x128xbf16, #tpu.memory_space<vmem>> -> memref<1x512x128xbf16, #tpu.memory_space<vmem>>
    %47 = tpu.memref_squeeze %46 : memref<1x512x128xbf16, #tpu.memory_space<vmem>> -> memref<512x128xbf16, #tpu.memory_space<vmem>>
    %c384 = arith.constant 384 : index
    %c0_24 = arith.constant 0 : index
    %48 = vector.load %47[%c384, %c0_24] : memref<512x128xbf16, #tpu.memory_space<vmem>>, vector<64x128xbf16>
    %cst_25 = arith.constant dense<0.000000e+00> : vector<8x128xf32>
    %49 = tpu.matmul %45, %48, %cst_25 {dimension_numbers = #tpu.dot_dimension_numbers<[1], [0], [0], [1], [0, 0, 1, 1], [], []>} : vector<8x64xbf16>, vector<64x128xbf16>, vector<8x128xf32> -> vector<8x128xf32>
    %50 = vector.extract_strided_slice %14 {offsets = [2, 0], sizes = [1, 128], strides = [1, 1]} : vector<16x128xf32> to vector<1x128xf32>
    %51 = vector.broadcast %50 : vector<1x128xf32> to vector<8x128xf32>
    %52 = arith.addf %49, %51 : vector<8x128xf32>
    %cst_26 = arith.constant 0.000000e+00 : f32
    %53 = vector.broadcast %cst_26 : f32 to vector<8x128xf32>
    %54 = arith.cmpf ogt, %52, %53 : vector<8x128xf32>
    %55 = vector.extract_strided_slice %14 {offsets = [7, 0], sizes = [1, 128], strides = [1, 1]} : vector<16x128xf32> to vector<1x128xf32>
    %56 = vector.broadcast %55 : vector<1x128xf32> to vector<8x128xf32>
    %57 = arith.mulf %56, %52 : vector<8x128xf32>
    %58 = arith.select %54, %52, %57 : vector<8x128xi1>, vector<8x128xf32>
    %59 = vector.extract_strided_slice %58 {offsets = [0, 0], sizes = [8, 32], strides = [1, 1]} : vector<8x128xf32> to vector<8x32xf32>
    %60 = arith.truncf %59 : vector<8x32xf32> to vector<8x32xbf16>
    %c0_i32_27 = arith.constant 0 : i32
    %c0_i32_28 = arith.constant 0 : i32
    %c0_i32_29 = arith.constant 0 : i32
    %61 = tpu.memref_slice %arg3[%c0_i32_27, %c0_i32_28, %c0_i32_29] : memref<2x512x128xbf16, #tpu.memory_space<vmem>> -> memref<1x512x128xbf16, #tpu.memory_space<vmem>>
    %62 = tpu.memref_squeeze %61 : memref<1x512x128xbf16, #tpu.memory_space<vmem>> -> memref<512x128xbf16, #tpu.memory_space<vmem>>
    %c448 = arith.constant 448 : index
    %c0_30 = arith.constant 0 : index
    %63 = vector.load %62[%c448, %c0_30] : memref<512x128xbf16, #tpu.memory_space<vmem>>, vector<32x128xbf16>
    %cst_31 = arith.constant dense<0.000000e+00> : vector<8x128xf32>
    %64 = tpu.matmul %60, %63, %cst_31 {dimension_numbers = #tpu.dot_dimension_numbers<[1], [0], [0], [1], [0, 0, 1, 1], [], []>} : vector<8x32xbf16>, vector<32x128xbf16>, vector<8x128xf32> -> vector<8x128xf32>
    %65 = vector.extract_strided_slice %14 {offsets = [3, 0], sizes = [1, 128], strides = [1, 1]} : vector<16x128xf32> to vector<1x128xf32>
    %66 = vector.broadcast %65 : vector<1x128xf32> to vector<8x128xf32>
    %67 = arith.addf %64, %66 : vector<8x128xf32>
    %cst_32 = arith.constant 0.000000e+00 : f32
    %68 = vector.broadcast %cst_32 : f32 to vector<8x128xf32>
    %69 = arith.cmpf ogt, %67, %68 : vector<8x128xf32>
    %70 = vector.extract_strided_slice %14 {offsets = [8, 0], sizes = [1, 128], strides = [1, 1]} : vector<16x128xf32> to vector<1x128xf32>
    %71 = vector.broadcast %70 : vector<1x128xf32> to vector<8x128xf32>
    %72 = arith.mulf %71, %67 : vector<8x128xf32>
    %73 = arith.select %69, %67, %72 : vector<8x128xi1>, vector<8x128xf32>
    %74 = vector.extract_strided_slice %73 {offsets = [0, 0], sizes = [8, 32], strides = [1, 1]} : vector<8x128xf32> to vector<8x32xf32>
    %75 = arith.truncf %74 : vector<8x32xf32> to vector<8x32xbf16>
    %c0_i32_33 = arith.constant 0 : i32
    %c0_i32_34 = arith.constant 0 : i32
    %c0_i32_35 = arith.constant 0 : i32
    %76 = tpu.memref_slice %arg3[%c0_i32_33, %c0_i32_34, %c0_i32_35] : memref<2x512x128xbf16, #tpu.memory_space<vmem>> -> memref<1x512x128xbf16, #tpu.memory_space<vmem>>
    %77 = tpu.memref_squeeze %76 : memref<1x512x128xbf16, #tpu.memory_space<vmem>> -> memref<512x128xbf16, #tpu.memory_space<vmem>>
    %c480 = arith.constant 480 : index
    %c0_36 = arith.constant 0 : index
    %78 = vector.load %77[%c480, %c0_36] : memref<512x128xbf16, #tpu.memory_space<vmem>>, vector<32x128xbf16>
    %cst_37 = arith.constant dense<0.000000e+00> : vector<8x128xf32>
    %79 = tpu.matmul %75, %78, %cst_37 {dimension_numbers = #tpu.dot_dimension_numbers<[1], [0], [0], [1], [0, 0, 1, 1], [], []>} : vector<8x32xbf16>, vector<32x128xbf16>, vector<8x128xf32> -> vector<8x128xf32>
    %80 = vector.extract_strided_slice %14 {offsets = [4, 0], sizes = [1, 128], strides = [1, 1]} : vector<16x128xf32> to vector<1x128xf32>
    %81 = vector.broadcast %80 : vector<1x128xf32> to vector<8x128xf32>
    %82 = arith.addf %79, %81 : vector<8x128xf32>
    %c0_38 = arith.constant 0 : index
    %c0_39 = arith.constant 0 : index
    %83 = vector.load %arg6[%c0_38, %c0_39] : memref<8x256xf32, #tpu.memory_space<vmem>>, vector<8x128xf32>
    tpu.vector_store %arg6[%c0_38, %c0_39], %82 {strides = array<i32>} : memref<8x256xf32, #tpu.memory_space<vmem>>, vector<8x128xf32>,
    %c1 = arith.constant 1 : index
    %c0_40 = arith.constant 0 : index
    %c0_41 = arith.constant 0 : index
    %84 = vector.load %arg5[%c1, %c0_40, %c0_41] : memref<2x16x128xf32, #tpu.memory_space<vmem>>, vector<1x16x128xf32>
    %85 = vector.shape_cast %84 : vector<1x16x128xf32> to vector<16x128xf32>
    %86 = vector.extract_strided_slice %12 {offsets = [0, 256], sizes = [8, 256], strides = [1, 1]} : vector<8x512xf32> to vector<8x256xf32>
    %87 = arith.truncf %86 : vector<8x256xf32> to vector<8x256xbf16>
    %c1_i32 = arith.constant 1 : i32
    %c0_i32_42 = arith.constant 0 : i32
    %c0_i32_43 = arith.constant 0 : i32
    %88 = tpu.memref_slice %arg3[%c1_i32, %c0_i32_42, %c0_i32_43] : memref<2x512x128xbf16, #tpu.memory_space<vmem>> -> memref<1x512x128xbf16, #tpu.memory_space<vmem>>
    %89 = tpu.memref_squeeze %88 : memref<1x512x128xbf16, #tpu.memory_space<vmem>> -> memref<512x128xbf16, #tpu.memory_space<vmem>>
    %c0_44 = arith.constant 0 : index
    %c0_45 = arith.constant 0 : index
    %90 = vector.load %89[%c0_44, %c0_45] : memref<512x128xbf16, #tpu.memory_space<vmem>>, vector<256x128xbf16>
    %cst_46 = arith.constant dense<0.000000e+00> : vector<8x128xf32>
    %91 = tpu.matmul %87, %90, %cst_46 {dimension_numbers = #tpu.dot_dimension_numbers<[1], [0], [0], [1], [0, 0, 1, 1], [], []>} : vector<8x256xbf16>, vector<256x128xbf16>, vector<8x128xf32> -> vector<8x128xf32>
    %92 = vector.extract_strided_slice %85 {offsets = [0, 0], sizes = [1, 128], strides = [1, 1]} : vector<16x128xf32> to vector<1x128xf32>
    %93 = vector.broadcast %92 : vector<1x128xf32> to vector<8x128xf32>
    %94 = arith.addf %91, %93 : vector<8x128xf32>
    %cst_47 = arith.constant 0.000000e+00 : f32
    %95 = vector.broadcast %cst_47 : f32 to vector<8x128xf32>
    %96 = arith.cmpf ogt, %94, %95 : vector<8x128xf32>
    %97 = vector.extract_strided_slice %85 {offsets = [5, 0], sizes = [1, 128], strides = [1, 1]} : vector<16x128xf32> to vector<1x128xf32>
    %98 = vector.broadcast %97 : vector<1x128xf32> to vector<8x128xf32>
    %99 = arith.mulf %98, %94 : vector<8x128xf32>
    %100 = arith.select %96, %94, %99 : vector<8x128xi1>, vector<8x128xf32>
    %101 = arith.truncf %100 : vector<8x128xf32> to vector<8x128xbf16>
    %c1_i32_48 = arith.constant 1 : i32
    %c0_i32_49 = arith.constant 0 : i32
    %c0_i32_50 = arith.constant 0 : i32
    %102 = tpu.memref_slice %arg3[%c1_i32_48, %c0_i32_49, %c0_i32_50] : memref<2x512x128xbf16, #tpu.memory_space<vmem>> -> memref<1x512x128xbf16, #tpu.memory_space<vmem>>
    %103 = tpu.memref_squeeze %102 : memref<1x512x128xbf16, #tpu.memory_space<vmem>> -> memref<512x128xbf16, #tpu.memory_space<vmem>>
    %c256_51 = arith.constant 256 : index
    %c0_52 = arith.constant 0 : index
    %104 = vector.load %103[%c256_51, %c0_52] : memref<512x128xbf16, #tpu.memory_space<vmem>>, vector<128x128xbf16>
    %cst_53 = arith.constant dense<0.000000e+00> : vector<8x128xf32>
    %105 = tpu.matmul %101, %104, %cst_53 {dimension_numbers = #tpu.dot_dimension_numbers<[1], [0], [0], [1], [0, 0, 1, 1], [], []>} : vector<8x128xbf16>, vector<128x128xbf16>, vector<8x128xf32> -> vector<8x128xf32>
    %106 = vector.extract_strided_slice %85 {offsets = [1, 0], sizes = [1, 128], strides = [1, 1]} : vector<16x128xf32> to vector<1x128xf32>
    %107 = vector.broadcast %106 : vector<1x128xf32> to vector<8x128xf32>
    %108 = arith.addf %105, %107 : vector<8x128xf32>
    %cst_54 = arith.constant 0.000000e+00 : f32
    %109 = vector.broadcast %cst_54 : f32 to vector<8x128xf32>
    %110 = arith.cmpf ogt, %108, %109 : vector<8x128xf32>
    %111 = vector.extract_strided_slice %85 {offsets = [6, 0], sizes = [1, 128], strides = [1, 1]} : vector<16x128xf32> to vector<1x128xf32>
    %112 = vector.broadcast %111 : vector<1x128xf32> to vector<8x128xf32>
    %113 = arith.mulf %112, %108 : vector<8x128xf32>
    %114 = arith.select %110, %108, %113 : vector<8x128xi1>, vector<8x128xf32>
    %115 = vector.extract_strided_slice %114 {offsets = [0, 0], sizes = [8, 64], strides = [1, 1]} : vector<8x128xf32> to vector<8x64xf32>
    %116 = arith.truncf %115 : vector<8x64xf32> to vector<8x64xbf16>
    %c1_i32_55 = arith.constant 1 : i32
    %c0_i32_56 = arith.constant 0 : i32
    %c0_i32_57 = arith.constant 0 : i32
    %117 = tpu.memref_slice %arg3[%c1_i32_55, %c0_i32_56, %c0_i32_57] : memref<2x512x128xbf16, #tpu.memory_space<vmem>> -> memref<1x512x128xbf16, #tpu.memory_space<vmem>>
    %118 = tpu.memref_squeeze %117 : memref<1x512x128xbf16, #tpu.memory_space<vmem>> -> memref<512x128xbf16, #tpu.memory_space<vmem>>
    %c384_58 = arith.constant 384 : index
    %c0_59 = arith.constant 0 : index
    %119 = vector.load %118[%c384_58, %c0_59] : memref<512x128xbf16, #tpu.memory_space<vmem>>, vector<64x128xbf16>
    %cst_60 = arith.constant dense<0.000000e+00> : vector<8x128xf32>
    %120 = tpu.matmul %116, %119, %cst_60 {dimension_numbers = #tpu.dot_dimension_numbers<[1], [0], [0], [1], [0, 0, 1, 1], [], []>} : vector<8x64xbf16>, vector<64x128xbf16>, vector<8x128xf32> -> vector<8x128xf32>
    %121 = vector.extract_strided_slice %85 {offsets = [2, 0], sizes = [1, 128], strides = [1, 1]} : vector<16x128xf32> to vector<1x128xf32>
    %122 = vector.broadcast %121 : vector<1x128xf32> to vector<8x128xf32>
    %123 = arith.addf %120, %122 : vector<8x128xf32>
    %cst_61 = arith.constant 0.000000e+00 : f32
    %124 = vector.broadcast %cst_61 : f32 to vector<8x128xf32>
    %125 = arith.cmpf ogt, %123, %124 : vector<8x128xf32>
    %126 = vector.extract_strided_slice %85 {offsets = [7, 0], sizes = [1, 128], strides = [1, 1]} : vector<16x128xf32> to vector<1x128xf32>
    %127 = vector.broadcast %126 : vector<1x128xf32> to vector<8x128xf32>
    %128 = arith.mulf %127, %123 : vector<8x128xf32>
    %129 = arith.select %125, %123, %128 : vector<8x128xi1>, vector<8x128xf32>
    %130 = vector.extract_strided_slice %129 {offsets = [0, 0], sizes = [8, 32], strides = [1, 1]} : vector<8x128xf32> to vector<8x32xf32>
    %131 = arith.truncf %130 : vector<8x32xf32> to vector<8x32xbf16>
    %c1_i32_62 = arith.constant 1 : i32
    %c0_i32_63 = arith.constant 0 : i32
    %c0_i32_64 = arith.constant 0 : i32
    %132 = tpu.memref_slice %arg3[%c1_i32_62, %c0_i32_63, %c0_i32_64] : memref<2x512x128xbf16, #tpu.memory_space<vmem>> -> memref<1x512x128xbf16, #tpu.memory_space<vmem>>
    %133 = tpu.memref_squeeze %132 : memref<1x512x128xbf16, #tpu.memory_space<vmem>> -> memref<512x128xbf16, #tpu.memory_space<vmem>>
    %c448_65 = arith.constant 448 : index
    %c0_66 = arith.constant 0 : index
    %134 = vector.load %133[%c448_65, %c0_66] : memref<512x128xbf16, #tpu.memory_space<vmem>>, vector<32x128xbf16>
    %cst_67 = arith.constant dense<0.000000e+00> : vector<8x128xf32>
    %135 = tpu.matmul %131, %134, %cst_67 {dimension_numbers = #tpu.dot_dimension_numbers<[1], [0], [0], [1], [0, 0, 1, 1], [], []>} : vector<8x32xbf16>, vector<32x128xbf16>, vector<8x128xf32> -> vector<8x128xf32>
    %136 = vector.extract_strided_slice %85 {offsets = [3, 0], sizes = [1, 128], strides = [1, 1]} : vector<16x128xf32> to vector<1x128xf32>
    %137 = vector.broadcast %136 : vector<1x128xf32> to vector<8x128xf32>
    %138 = arith.addf %135, %137 : vector<8x128xf32>
    %cst_68 = arith.constant 0.000000e+00 : f32
    %139 = vector.broadcast %cst_68 : f32 to vector<8x128xf32>
    %140 = arith.cmpf ogt, %138, %139 : vector<8x128xf32>
    %141 = vector.extract_strided_slice %85 {offsets = [8, 0], sizes = [1, 128], strides = [1, 1]} : vector<16x128xf32> to vector<1x128xf32>
    %142 = vector.broadcast %141 : vector<1x128xf32> to vector<8x128xf32>
    %143 = arith.mulf %142, %138 : vector<8x128xf32>
    %144 = arith.select %140, %138, %143 : vector<8x128xi1>, vector<8x128xf32>
    %145 = vector.extract_strided_slice %144 {offsets = [0, 0], sizes = [8, 32], strides = [1, 1]} : vector<8x128xf32> to vector<8x32xf32>
    %146 = arith.truncf %145 : vector<8x32xf32> to vector<8x32xbf16>
    %c1_i32_69 = arith.constant 1 : i32
    %c0_i32_70 = arith.constant 0 : i32
    %c0_i32_71 = arith.constant 0 : i32
    %147 = tpu.memref_slice %arg3[%c1_i32_69, %c0_i32_70, %c0_i32_71] : memref<2x512x128xbf16, #tpu.memory_space<vmem>> -> memref<1x512x128xbf16, #tpu.memory_space<vmem>>
    %148 = tpu.memref_squeeze %147 : memref<1x512x128xbf16, #tpu.memory_space<vmem>> -> memref<512x128xbf16, #tpu.memory_space<vmem>>
    %c480_72 = arith.constant 480 : index
    %c0_73 = arith.constant 0 : index
    %149 = vector.load %148[%c480_72, %c0_73] : memref<512x128xbf16, #tpu.memory_space<vmem>>, vector<32x128xbf16>
    %cst_74 = arith.constant dense<0.000000e+00> : vector<8x128xf32>
    %150 = tpu.matmul %146, %149, %cst_74 {dimension_numbers = #tpu.dot_dimension_numbers<[1], [0], [0], [1], [0, 0, 1, 1], [], []>} : vector<8x32xbf16>, vector<32x128xbf16>, vector<8x128xf32> -> vector<8x128xf32>
    %151 = vector.extract_strided_slice %85 {offsets = [4, 0], sizes = [1, 128], strides = [1, 1]} : vector<16x128xf32> to vector<1x128xf32>
    %152 = vector.broadcast %151 : vector<1x128xf32> to vector<8x128xf32>
    %153 = arith.addf %150, %152 : vector<8x128xf32>
    %c0_75 = arith.constant 0 : index
    %c128 = arith.constant 128 : index
    %154 = vector.load %arg6[%c0_75, %c128] : memref<8x256xf32, #tpu.memory_space<vmem>>, vector<8x128xf32>
    tpu.vector_store %arg6[%c0_75, %c128], %153 {strides = array<i32>} : memref<8x256xf32, #tpu.memory_space<vmem>>, vector<8x128xf32>,
    return
  }
  func.func @transform_0(%arg0: i32) -> (i32, i32) {
    %c0_i32 = arith.constant 0 : i32
    %c0_i32_0 = arith.constant 0 : i32
    return %arg0, %c0_i32 : i32, i32
  }
  func.func @transform_1(%arg0: i32) -> (i32, i32) {
    %c0_i32 = arith.constant 0 : i32
    %c0_i32_0 = arith.constant 0 : i32
    %c0_i32_1 = arith.constant 0 : i32
    return %c0_i32, %c0_i32_0 : i32, i32
  }
  func.func @transform_2(%arg0: i32) -> (i32, i32, i32) {
    %c0_i32 = arith.constant 0 : i32
    %c0_i32_0 = arith.constant 0 : i32
    %c0_i32_1 = arith.constant 0 : i32
    %c0_i32_2 = arith.constant 0 : i32
    return %c0_i32, %c0_i32_0, %c0_i32_1 : i32, i32, i32
  }
  func.func @transform_3(%arg0: i32) -> (i32, i32) {
    %c0_i32 = arith.constant 0 : i32
    %c0_i32_0 = arith.constant 0 : i32
    %c0_i32_1 = arith.constant 0 : i32
    return %c0_i32, %c0_i32_0 : i32, i32
  }
  func.func @transform_4(%arg0: i32) -> (i32, i32, i32) {
    %c0_i32 = arith.constant 0 : i32
    %c0_i32_0 = arith.constant 0 : i32
    %c0_i32_1 = arith.constant 0 : i32
    %c0_i32_2 = arith.constant 0 : i32
    return %c0_i32, %c0_i32_0, %c0_i32_1 : i32, i32, i32
  }
  func.func @transform_5(%arg0: i32) -> (i32, i32) {
    %c0_i32 = arith.constant 0 : i32
    %c0_i32_0 = arith.constant 0 : i32
    return %arg0, %c0_i32 : i32, i32
  }
}

</mosaic_0001>

<bundles_post_ra>
// kernel: _encoder_forward.1
= control target key start
LH: loop header
LB: loop body
LE: loop exit
PB: predicated region body
PF: predicated region fallthrough
CT: control target
= control target key end

     0   :  { %10 = vsyncpa [#allocation3], 0  ;;  %s1909_s0 = inlined_call_operand.vmem [shape: bf16[8,32], index: 0, kind: input, shape index: {}]   ;;  %s1910_s1 = inlined_call_operand.hbm [shape: bf16[32,512], index: 1, kind: input, shape index: {}]   ;;  %s1911_s2 = inlined_call_operand.hbm [shape: bf16[2,512,128], index: 2, kind: input, shape index: {}]   ;;  %s1912_s3 = inlined_call_operand.vmem [shape: f32[8,512], index: 3, kind: input, shape index: {}]   ;;  %s1913_s4 = inlined_call_operand.hbm [shape: f32[2,16,128], index: 4, kind: input, shape index: {}]   ;;  %s1914_s5 = inlined_call_operand.vmem [shape: f32[8,256], index: 5, kind: output, shape index: {}]  }
   0x1   :  { %11 = vsyncpa [#allocation5], 0  ;;  %s1710_s18 = smov [#allocation4]  }
   0x2   :  { %s31_s19 = sshll.u32 %s1710_s18, 4  ;;  %s32_s19 = int_to_ptr.vmem [resolvable:$true] %s31_s19 }
   0x3   :  { %s1654_s20 = scalar_lea.vmem %s32_s19, 8192  ;;  %p1659_p1 = scmp.lt.s32.totalorder %s32_s19, %s32_s19 }
   0x4   :  { %p1655_p0 = scmp.ne.s32.totalorder %s32_s19, %s1654_s20  ;;  %p1660_p2 = scmp.lt.s32.totalorder %s1654_s20, %s1654_s20 }
   0x6   :  { %p1661_p3 = por %p1660_p2, %p1659_p1 }
   0x8   :  { %p1662_p4 = pnand %p1661_p3, %p1655_p0 }
   0xa   :  { %1665 = shalt.err (!%p1662_p4)
}
   0xb   :  { %s1711_s21 = smov 64   ;;  %s1712_s22 = smov 4  }
   0xc   :  { %37 = dma.hbm_to_vmem [thread:$0]  %s1911_s2, 8192, %s32_s19, [#allocation5], %s1711_s21, %s1711_s21, %s1712_s22  }
   0xd   :  { %s1713_s25 = smov [#allocation2]  }
   0xe   :  { %s19_s26 = sshll.u32 %s1713_s25, 4  ;;  %s20_s26 = int_to_ptr.vmem [resolvable:$true] %s19_s26 }
   0xf   :  { %s1674_s27 = scalar_lea.vmem %s20_s26, 1024  ;;  %p1679_p6 = scmp.lt.s32.totalorder %s20_s26, %s20_s26 }
  0x10   :  { %p1675_p5 = scmp.ne.s32.totalorder %s20_s26, %s1674_s27  ;;  %p1680_p7 = scmp.lt.s32.totalorder %s1674_s27, %s1674_s27 }
  0x12   :  { %p1681_p8 = por %p1680_p7, %p1679_p6 }
  0x14   :  { %p1682_p9 = pnand %p1681_p8, %p1675_p5 }
  0x16   :  { %1685 = shalt.err (!%p1682_p9)
}
  0x17   :  { %s1714_s28 = smov 256   ;;  %s1715_s29 = smov 16  }
  0x18   :  { %25 = dma.hbm_to_vmem [thread:$0]  %s1910_s1, 1024, %s20_s26, [#allocation3], %s1714_s28, %s1714_s28, %s1715_s29  }
  0x19   :  { %s1716_s7 = smov [#allocation6]  }
  0x1a   :  { %s45_s8 = sshll.u32 %s1716_s7, 4  ;;  %s46_s8 = int_to_ptr.vmem [resolvable:$true] %s45_s8 }
  0x1b   :  { %s1694_s2 = scalar_lea.vmem %s46_s8, 512  ;;  %p1699_p11 = scmp.lt.s32.totalorder %s46_s8, %s46_s8 }
  0x1c   :  { %p1695_p10 = scmp.ne.s32.totalorder %s46_s8, %s1694_s2  ;;  %p1700_p12 = scmp.lt.s32.totalorder %s1694_s2, %s1694_s2 }
  0x1e   :  { %p1701_p13 = por %p1700_p12, %p1699_p11 }
  0x20   :  { %p1702_p0 = pnand %p1701_p13, %p1695_p10 }
  0x22   :  { %1705 = shalt.err (!%p1702_p0)
}
  0x23   :  { %s1717_s9 = smov 128   ;;  %s1718_s10 = smov 8  }
  0x24   :  { %51 = dma.hbm_to_vmem [thread:$0]  %s1913_s4, 512, %s46_s8, [#allocation5], %s1717_s9, %s1717_s9, %s1718_s10  }
  0x25   :  { %1706 = dma.done.wait [#allocation3], 1024  }
  0x26   :  { %1707 = vsyncadd [#allocation3], 4294966272 }
  0x27   :  { %1708 = dma.done.wait [#allocation5], 8704  }
  0x28   :  { %1709 = vsyncadd [#allocation5], 4294958592  ;;  %v1719_v0 = vmov 0   ;;  %v1570_v1 = vld [vmem:[#allocation2 + $0x24] ss:$16 sps:$4 sm:$0xff]   ;;  %v1576_v5 = vld [vmem:[#allocation4 + $0x78] sm:$0xff]   ;;  %v75_v32 = vlaneseq }
  0x29   :  { %167 = vmatprep.mubr.bf16.mxu0 %v1719_v0  ;;  %208 = vmatprep.mubr.bf16.mxu1 %v1719_v0  ;;  %v1572_v2 = vld [vmem:[#allocation2 + $0x20] ss:$16 sps:$4 sm:$0xff]   ;;  %v1573_v3 = vld [vmem:[#allocation2 + $0x4] ss:$16 sps:$4 sm:$0xff]   ;;  %vm131_vm0 = vcmask 261120   ;;  %v1577_v7 = vld [vmem:[#allocation4 + $0x38] sm:$0xff]  }
  0x2a   :  { %147 = vmatprep.subr.bf16.mxu0 %v1570_v1  ;;  %v1575_v4 = vld [vmem:[#allocation2] ss:$16 sps:$4 sm:$0xff]   ;;  %v1580_v10 = vld [vmem:[#allocation4 + $0x68] sm:$0xff]   ;;  %v1584_v14 = vld [vmem:[#allocation4 + $0x58] sm:$0xff]   ;;  %v1720_v25 = vmov 0.0   ;;  %v1773_v33 = vshrl.u32 %v75_v32, 7 }
  0x2b   :  { %148 = vmatpush1.bf16.msra.mxu0 %v1572_v2  ;;  %v66_v6 = vld [vmem:[%s1909_s0] sm:$0xf]  ;;  %v1578_v8 = vld [vmem:[#allocation4 + $0x70] sm:$0xff]   ;;  %v1581_v11 = vld [vmem:[#allocation4 + $0x28] sm:$0xff]   ;;  %vm1721_vm3 = vmmov 0   ;;  %vm581_vm7 = vcmask 523264  }
  0x2c   :  { %149 = vmatprep.subr.bf16.mxu0 %v1573_v3  ;;  %v1579_v9 = vld [vmem:[#allocation4 + $0x30] sm:$0xff]   ;;  %v1582_v12 = vld [vmem:[#allocation4 + $0x60] sm:$0xff]   ;;  %v1585_v15 = vld [vmem:[#allocation4 + $0x18] sm:$0xff]   ;;  %v1776_v34 = vsub.s32 0, %v1773_v33  ;;  %v1782_v36 = vsub.s32 1, %v1773_v33  ;;  %v424_v0 = vsub.s32 5, %v1773_v33 }
  0x2d   :  { %v1583_v13 = vld [vmem:[#allocation4 + $0x20] sm:$0xff]   ;;  %v1586_v16 = vld [vmem:[#allocation4 + $0x50] sm:$0xff]   ;;  %v1588_v18 = vld [vmem:[#allocation4 + $0x48] sm:$0xff]  }
  0x2e   :  { %v1587_v17 = vld [vmem:[#allocation4 + $0x10] sm:$0xff]   ;;  %v1589_v19 = vld [vmem:[#allocation4 + $0x8] sm:$0xff]   ;;  %v1590_v20 = vld [vmem:[#allocation4 + $0x40] sm:$0xff]  }
  0x2f   :  { %150 = vmatpush1.bf16.msra.mxu0 %v1575_v4  ;;  %v1591_v21 = vld [vmem:[#allocation4] sm:$0xff]   ;;  %v1592_v22 = vld [vmem:[#allocation2 + $0x2c] ss:$16 sps:$4 sm:$0xff]   ;;  %v1594_v23 = vld [vmem:[#allocation2 + $0x28] ss:$16 sps:$4 sm:$0xff]  }
  0x30   :  { %1378 = vmatprep.subr.bf16.mxu0 %v1576_v5  ;;  %v1595_v24 = vld [vmem:[#allocation2 + $0xc] ss:$16 sps:$4 sm:$0xff]   ;;  %188 = vmatprep.subr.bf16.mxu1 %v1592_v22  ;;  %v1597_v26 = vld [vmem:[#allocation2 + $0x8] ss:$16 sps:$4 sm:$0xff]   ;;  %v1599_v28 = vld [vmem:[#allocation4 + $0xb0] sm:$0xff]  }
  0x31   :  { %189 = vmatpush1.bf16.msra.mxu1 %v1594_v23  ;;  %v1598_v27 = vld [vmem:[#allocation4 + $0xb8] sm:$0xff]   ;;  %v1600_v29 = vld [vmem:[#allocation4 + $0xa8] sm:$0xff]   ;;  %v1601_v30 = vld [vmem:[#allocation4 + $0xa0] sm:$0xff]  }
  0x32   :  { %1306 = vmatmul.mubr.msk.bf16.vlgmr.msra.gmra.mxu0 %vm131_vm0, %v66_v6  ;;  %190 = vmatprep.subr.bf16.mxu1 %v1595_v24  ;;  %v1602_v31 = vld [vmem:[#allocation4 + $0x98] sm:$0xff]   ;;  %v62_v35 = vld [vmem:[%s1912_s3] sm:$0xff]  ;;  %v63_v37 = vld [vmem:[%s1912_s3 + $0x8] sm:$0xff] }
  0x33   :  { %1379 = vmatpush3.bf16.msra.mxu0 %v1577_v7  ;;  %v78_v38 = vrot.slane %v62_v35, %v1776_v34  ;;  %v224_v39 = vrot.slane %v62_v35, %v1782_v36  ;;  %v82_v40 = vrot.slane %v63_v37, %v1776_v34  ;;  %v228_v43 = vrot.slane %v63_v37, %v1782_v36  ;;  %v1603_v54 = vld [vmem:[#allocation4 + $0x90] sm:$0xff]   ;;  %v1604_v55 = vld [vmem:[#allocation4 + $0x88] sm:$0xff]   ;;  %v1605_v56 = vld [vmem:[#allocation4 + $0x80] sm:$0xff]  }
  0x34   :  { %1380 = vmatprep.subr.bf16.mxu0 %v1578_v8  ;;  %v1606_v58 = vld [vmem:[#allocation4 + $0xd8] sm:$0xff]   ;;  %v1607_v60 = vld [vmem:[#allocation4 + $0xd0] sm:$0xff]   ;;  %v1802_v63 = vld [vmem:[#allocation6] sm:$0xff] }
  0x35   :  { %191 = vmatpush1.bf16.msra.mxu1 %v1597_v26  ;;  %v284_v2 = vrot.slane %v1802_v63, %v1776_v34  ;;  %v425_v5 = vrot.slane %v1802_v63, %v424_v0  ;;  %v1612_v37 = vld [vmem:[#allocation4 + $0x170] sm:$0xff]  }
  0x36   :  { %1462 = vmatprep.subr.bf16.mxu1 %v1720_v25 }
  0x37   :  { %1381 = vmatpush3.bf16.msra.mxu0 %v1579_v9 }
  0x38   :  { %1382 = vmatprep.subr.bf16.mxu0 %v1580_v10  ;;  %1307 = vmatmul.mubr.msk.bf16.vlgmr.msra.gmra.mxu1 %vm131_vm0, %v66_v6 }
  0x39   :  { %1463 = vmatpush3.bf16.msra.mxu1 %v1598_v27  ;;  %1478 = vmatprep.mubr.msk.bf16.mxu1 %vm1721_vm3, %v1720_v25 }
  0x3a   :  { %1464 = vmatprep.subr.bf16.mxu1 %v1720_v25 }
  0x3b   :  { %1383 = vmatpush3.bf16.msra.mxu0 %v1581_v11 }
  0x3c   :  { %1384 = vmatprep.subr.bf16.mxu0 %v1582_v12  ;;  %v1608_v12 = vld [vmem:[#allocation4 + $0xc8] sm:$0xff]  }
  0x3d   :  { %1465 = vmatpush3.bf16.msra.mxu1 %v1599_v28 }
  0x3e   :  { %1466 = vmatprep.subr.bf16.mxu1 %v1720_v25 }
  0x3f   :  { %1385 = vmatpush3.bf16.msra.mxu0 %v1583_v13  ;;  %v1609_v13 = vld [vmem:[#allocation4 + $0xc0] sm:$0xff]  }
  0x40   :  { %1386 = vmatprep.subr.bf16.mxu0 %v1584_v14  ;;  %v1610_v14 = vld [vmem:[#allocation4 + $0x178] sm:$0xff]  }
  0x41   :  { %1467 = vmatpush3.bf16.msra.mxu1 %v1600_v29 }
  0x42   :  { %1468 = vmatprep.subr.bf16.mxu1 %v1720_v25 }
  0x43   :  { %1387 = vmatpush3.bf16.msra.mxu0 %v1585_v15  ;;  %v65_v15 = vld [vmem:[%s1912_s3 + $0x18] sm:$0xff] }
  0x44   :  { %1388 = vmatprep.subr.bf16.mxu0 %v1586_v16  ;;  %v90_v16 = vrot.slane %v65_v15, %v1776_v34 }
  0x45   :  { %1469 = vmatpush3.bf16.msra.mxu1 %v1601_v30 }
  0x46   :  { %1470 = vmatprep.subr.bf16.mxu1 %v1720_v25 }
  0x47   :  { %1389 = vmatpush3.bf16.msra.mxu0 %v1587_v17  ;;  %v540_v17 = vsub.s32 6, %v1773_v33 }
  0x48   :  { %1390 = vmatprep.subr.bf16.mxu0 %v1588_v18 }
  0x49   :  { %1471 = vmatpush3.bf16.msra.mxu1 %v1602_v31  ;;  %v1611_v31 = vld [vmem:[#allocation4 + $0x138] sm:$0xff]  }
  0x4a   :  { %1472 = vmatprep.subr.bf16.mxu1 %v1720_v25 }
  0x4b   :  { %1391 = vmatpush3.bf16.msra.mxu0 %v1589_v19  ;;  %v236_v19 = vrot.slane %v65_v15, %v1782_v36 }
  0x4c   :  { %1392 = vmatprep.subr.bf16.mxu0 %v1590_v20  ;;  %v448_v20 = vrot.slane %v1802_v63, %v1782_v36 }
  0x4d   :  { %1473 = vmatpush3.bf16.msra.mxu1 %v1603_v54  ;;  %v1624_v54 = vld [vmem:[#allocation4 + $0x140] sm:$0xff]  }
  0x4e   :  { %1474 = vmatprep.subr.bf16.mxu1 %v1720_v25 }
  0x4f   :  { %1393 = vmatpush3.bf16.msra.mxu0 %v1591_v21  ;;  %v541_v21 = vrot.slane %v1802_v63, %v540_v17 }
  0x50   :  { %1482 = vmatprep.subr.bf16.mxu0 %v1720_v25 }
  0x51   :  { %1475 = vmatpush3.bf16.msra.mxu1 %v1604_v55 }
  0x52   :  { %1476 = vmatprep.subr.bf16.mxu1 %v1720_v25 }
  0x55   :  { %1477 = vmatpush3.bf16.msra.mxu1 %v1605_v56  ;;  %v1625_v56 = vld [vmem:[#allocation4 + $0x100] sm:$0xff]  }
  0x56   :  { %1494 = vmatprep.subr.bf16.mxu1 %v1720_v25 }
  0xf2   :  { %v169_v41 = vpop.f32.mrf.mxu0 }
  0xf3   :  { %v170_v42 = vadd.f32 %v169_v41, %v78_v38  ;;  %v1615_v41 = vld [vmem:[#allocation4 + $0x128] sm:$0xff]  }
  0xf4   :  { %v171_v44 = vpop.f32.mrf.mxu0 }
  0xf5   :  { %vm217_vm1 = vcmp.gt.f32.partialorder %v170_v42, 0.0  ;;  %v237_v45 = vmul.f32 %v224_v39, %v170_v42  ;;  %v172_v46 = vadd.f32 %v171_v44, %v82_v40  ;;  %v1613_v39 = vld [vmem:[#allocation4 + $0x130] sm:$0xff]   ;;  %v1614_v40 = vld [vmem:[#allocation4 + $0x168] sm:$0xff]   ;;  %v1618_v44 = vld [vmem:[#allocation4 + $0x158] sm:$0xff]  }
  0xf6   :  { %v173_v47 = vpop.f32.mrf.mxu0 }
  0xf7   :  { %vm218_vm2 = vcmp.gt.f32.partialorder %v172_v46, 0.0  ;;  %v238_v48 = vmul.f32 %v228_v43, %v172_v46  ;;  %v241_v49 = vsel %vm217_vm1, %v170_v42, %v237_v45  ;;  %v1616_v42 = vld [vmem:[#allocation4 + $0x160] sm:$0xff]   ;;  %v64_v45 = vld [vmem:[%s1912_s3 + $0x10] sm:$0xff] }
  0xf8   :  { %v174_v50 = vpop.f32.mrf.mxu0  ;;  %v247_v53 = vpack.c.bf16 %v241_v49, %v241_v49  ;;  %v1798_v57 = vpop.f32.mrf.mxu1  ;;  %v1617_v43 = vld [vmem:[#allocation4 + $0x120] sm:$0xff]   ;;  %v1620_v47 = vld [vmem:[#allocation4 + $0x150] sm:$0xff]  }
  0xf9   :  { %v242_v51 = vsel %vm218_vm2, %v172_v46, %v238_v48  ;;  %v1619_v46 = vld [vmem:[#allocation4 + $0x118] sm:$0xff]   ;;  %v86_v48 = vrot.slane %v64_v45, %v1776_v34  ;;  %v1621_v49 = vld [vmem:[#allocation4 + $0x110] sm:$0xff]   ;;  %v1622_v50 = vld [vmem:[#allocation4 + $0x148] sm:$0xff]  }
  0xfa   :  { %v248_v52 = vpack.c.bf16 %v242_v51, %v242_v51  ;;  %v212_v59 = vpop.f32.mrf.mxu1 }
  0xfb   :  { %v213_v18 = vadd.f32 %v212_v59, %v90_v16  ;;  %v211_v51 = vadd.f32 %v1798_v57, %v86_v48  ;;  %v1626_v57 = vld [vmem:[#allocation4 + $0xe8] sm:$0xff]   ;;  %v1628_v16 = vld [vmem:[#allocation4 + $0xf8] sm:$0xff]  }
  0xfc   :  { %413 = vmatprep.mubr.bf16.mxu0 %v248_v52  ;;  %v214_v61 = vpop.f32.mrf.mxu1  ;;  %v232_v52 = vrot.slane %v64_v45, %v1782_v36  ;;  %v1636_v45 = vld [vmem:[#allocation4 + $0x188] sm:$0xff]  }
  0xfd   :  { %414 = vmatmul.mubr.bf16.vlgmr.msra.gmra.mxu0 %v247_v53  ;;  %v240_v22 = vmul.f32 %v236_v19, %v213_v18  ;;  %vm220_vm5 = vcmp.gt.f32.partialorder %v213_v18, 0.0  ;;  %v1623_v53 = vld [vmem:[#allocation4 + $0x108] sm:$0xff]   ;;  %vm219_vm8 = vcmp.gt.f32.partialorder %v211_v51, 0.0  ;;  %v555_v61 = vsub.s32 2, %v1773_v33 }
  0xfe   :  { %1490 = vmatprep.mubr.msk.bf16.mxu0 %vm1721_vm3, %v1720_v25  ;;  %1483 = vmatpush3.bf16.msra.mxu0 %v1606_v58  ;;  %v215_v62 = vpop.f32.mrf.mxu1  ;;  %v239_v55 = vmul.f32 %v232_v52, %v211_v51  ;;  %v639_v19 = vsub.s32 3, %v1773_v33  ;;  %v1641_v52 = vld [vmem:[#allocation4 + $0x1c0] sm:$0xff]  }
  0xff   :  { %1484 = vmatprep.subr.bf16.mxu0 %v1720_v25  ;;  %v244_v29 = vsel %vm220_vm5, %v213_v18, %v240_v22  ;;  %v628_v62 = vsub.s32 7, %v1773_v33  ;;  %v1629_v18 = vld [vmem:[#allocation4 + $0xf0] sm:$0xff]  }
 0x100   :  { %v772_v38 = vpack.c.bf16 %v244_v29, %v244_v29  ;;  %v243_v58 = vsel %vm219_vm8, %v211_v51, %v239_v55  ;;  %v1640_v51 = vld [vmem:[#allocation4 + $0x1c8] sm:$0xff]  }
 0x101   :  { %v771_v59 = vpack.c.bf16 %v243_v58, %v243_v58 }
 0x102   :  { %1485 = vmatpush3.bf16.msra.mxu0 %v1607_v60  ;;  %v1627_v60 = vld [vmem:[#allocation4 + $0xe0] sm:$0xff]  }
 0x103   :  { %1486 = vmatprep.subr.bf16.mxu0 %v1720_v25 }
 0x106   :  { %1487 = vmatpush3.bf16.msra.mxu0 %v1608_v12 }
 0x107   :  { %1488 = vmatprep.subr.bf16.mxu0 %v1720_v25 }
 0x10a   :  { %1489 = vmatpush3.bf16.msra.mxu0 %v1609_v13 }
 0x10b   :  { %1420 = vmatprep.subr.bf16.mxu0 %v1610_v14 }
 0x1bd   :  { %v1394_v1 = vpop.f32.mrf.mxu0 }
 0x1bf   :  { %v1395_v3 = vpop.f32.mrf.mxu0 }
 0x1c0   :  { %v1396_v4 = vadd.f32 %v1395_v3, %v1394_v1  ;;  %v556_v1 = vrot.slane %v1802_v63, %v555_v61 }
 0x1c1   :  { %v1397_v6 = vpop.f32.mrf.mxu0 }
 0x1c2   :  { %v416_v7 = vadd.f32 %v1396_v4, %v284_v2  ;;  %v629_v2 = vrot.slane %v1802_v63, %v628_v62 }
 0x1c3   :  { %v1398_v8 = vpop.f32.mrf.mxu0 }
 0x1c4   :  { %vm421_vm4 = vcmp.gt.f32.partialorder %v416_v7, 0.0  ;;  %v426_v9 = vmul.f32 %v425_v5, %v416_v7 }
 0x1c6   :  { %v427_v10 = vsel %vm421_vm4, %v416_v7, %v426_v9 }
 0x1c7   :  { %v428_v11 = vpack.c.bf16 %v427_v10, %v427_v10 }
 0x1c9   :  { %1479 = vmatmul.mubr.bf16.vlgmr.msra.gmra.mxu1 %v428_v11 }
 0x1ca   :  { %1498 = vmatprep.mubr.msk.bf16.mxu1 %vm1721_vm3, %v1720_v25  ;;  %1495 = vmatpush3.bf16.msra.mxu1 %v1626_v57 }
 0x1cb   :  { %1496 = vmatprep.subr.bf16.mxu1 %v1720_v25 }
 0x1ce   :  { %1497 = vmatpush3.bf16.msra.mxu1 %v1627_v60 }
 0x1cf   :  { %1502 = vmatprep.subr.bf16.mxu1 %v1720_v25 }
 0x289   :  { %v531_v23 = vpop.f32.mrf.mxu1 }
 0x28a   :  { %v532_v24 = vadd.f32 %v531_v23, %v448_v20  ;;  %v246_v20 = vld [vmem:[#allocation6 + $0x8] sm:$0xff] }
 0x28b   :  { %v1480_v26 = vpop.f32.mrf.mxu1  ;;  %v700_v22 = vrot.slane %v246_v20, %v1776_v34 }
 0x28c   :  { %vm537_vm6 = vcmp.gt.f32.partialorder %v532_v24, 0.0  ;;  %v542_v27 = vmul.f32 %v541_v21, %v532_v24  ;;  %v640_v21 = vrot.slane %v1802_v63, %v639_v19 }
 0x28d   :  { %v534_v28 = vpop.f32.mrf.mxu1 }
 0x28e   :  { %v543_v30 = vsel %vm537_vm6, %v532_v24, %v542_v27 }
 0x28f   :  { %v544_v32 = vpack.c.bf16 %v543_v30, %v543_v30  ;;  %v1481_v35 = vpop.f32.mrf.mxu1  ;;  %v1630_v30 = vld [vmem:[#allocation4 + $0x1b8] sm:$0xff]  }
 0x290   :  { %v1631_v35 = vld [vmem:[#allocation4 + $0x1b0] sm:$0xff]  }
 0x291   :  { %1491 = vmatmul.mubr.msk.bf16.vlgmr.msra.gmra.mxu0 %vm581_vm7, %v544_v32 }
 0x292   :  { %1421 = vmatpush3.bf16.msra.mxu0 %v1611_v31  ;;  %938 = vmatprep.mubr.bf16.mxu0 %v772_v38  ;;  %v1633_v38 = vld [vmem:[#allocation4 + $0x1a0] sm:$0xff]  }
 0x293   :  { %1422 = vmatprep.subr.bf16.mxu0 %v1612_v37  ;;  %v1632_v37 = vld [vmem:[#allocation4 + $0x1a8] sm:$0xff]  }
 0x296   :  { %1423 = vmatpush3.bf16.msra.mxu0 %v1613_v39  ;;  %v1860_v39 = vld [vmem:[#allocation6 + $0x10] sm:$0xff] }
 0x297   :  { %1424 = vmatprep.subr.bf16.mxu0 %v1614_v40  ;;  %v1634_v40 = vld [vmem:[#allocation4 + $0x198] sm:$0xff]   ;;  %v973_v60 = vrot.slane %v1860_v39, %v1782_v36  ;;  %v1643_v36 = vld [vmem:[#allocation4 + $0x1e0] sm:$0xff]  }
 0x29a   :  { %1425 = vmatpush3.bf16.msra.mxu0 %v1615_v41  ;;  %v809_v41 = vrot.slane %v1860_v39, %v1776_v34 }
 0x29b   :  { %1426 = vmatprep.subr.bf16.mxu0 %v1616_v42  ;;  %v1635_v42 = vld [vmem:[#allocation4 + $0x190] sm:$0xff]  }
 0x29e   :  { %1427 = vmatpush3.bf16.msra.mxu0 %v1617_v43 }
 0x29f   :  { %1428 = vmatprep.subr.bf16.mxu0 %v1618_v44  ;;  %v950_v44 = vrot.slane %v1860_v39, %v424_v0  ;;  %v1638_v0 = vld [vmem:[#allocation4 + $0x1d8] sm:$0xff]  }
 0x2a2   :  { %1429 = vmatpush3.bf16.msra.mxu0 %v1619_v46 }
 0x2a3   :  { %1430 = vmatprep.subr.bf16.mxu0 %v1620_v47  ;;  %v1637_v47 = vld [vmem:[#allocation4 + $0x180] sm:$0xff]  }
 0x2a6   :  { %1431 = vmatpush3.bf16.msra.mxu0 %v1621_v49 }
 0x2a7   :  { %1432 = vmatprep.subr.bf16.mxu0 %v1622_v50  ;;  %v1639_v50 = vld [vmem:[#allocation4 + $0x1d0] sm:$0xff]  }
 0x2aa   :  { %1433 = vmatpush3.bf16.msra.mxu0 %v1623_v53  ;;  %v710_v53 = vsub.s32 4, %v1773_v33 }
 0x2ab   :  { %1434 = vmatprep.subr.bf16.mxu0 %v1624_v54 }
 0x2ac   :  { %v711_v54 = vrot.slane %v1802_v63, %v710_v53 }
 0x2ae   :  { %1435 = vmatpush3.bf16.msra.mxu0 %v1625_v56 }
 0x2af   :  { %1530 = vmatprep.subr.bf16.mxu0 %v1720_v25 }
 0x2b1   :  { %939 = vmatmul.mubr.bf16.vlgmr.msra.gmra.mxu0 %v771_v59 }
 0x2b2   :  { %1538 = vmatprep.mubr.msk.bf16.mxu0 %vm1721_vm3, %v1720_v25  ;;  %1531 = vmatpush3.bf16.msra.mxu0 %v1638_v0 }
 0x2b3   :  { %1532 = vmatprep.subr.bf16.mxu0 %v1720_v25 }
 0x2b6   :  { %1533 = vmatpush3.bf16.msra.mxu0 %v1639_v50 }
 0x2b7   :  { %1534 = vmatprep.subr.bf16.mxu0 %v1720_v25 }
 0x2ba   :  { %1535 = vmatpush3.bf16.msra.mxu0 %v1640_v51 }
 0x2bb   :  { %1536 = vmatprep.subr.bf16.mxu0 %v1720_v25 }
 0x2be   :  { %1537 = vmatpush3.bf16.msra.mxu0 %v1641_v52 }
 0x351   :  { %v619_v3 = vpop.f32.mrf.mxu0 }
 0x352   :  { %v620_v4 = vadd.f32 %v619_v3, %v556_v1  ;;  %v1066_v1 = vrot.slane %v1860_v39, %v540_v17  ;;  %v1081_v17 = vrot.slane %v1860_v39, %v555_v61  ;;  %v1645_v61 = vld [vmem:[#allocation4 + $0x1f0] sm:$0xff]  }
 0x353   :  { %v1492_v5 = vpop.f32.mrf.mxu0 }
 0x354   :  { %vm625_vm9 = vcmp.gt.f32.partialorder %v620_v4, 0.0  ;;  %v630_v6 = vmul.f32 %v629_v2, %v620_v4 }
 0x355   :  { %v622_v7 = vpop.f32.mrf.mxu0 }
 0x356   :  { %v631_v8 = vsel %vm625_vm9, %v620_v4, %v630_v6 }
 0x357   :  { %v632_v9 = vpack.c.bf16 %v631_v8, %v631_v8  ;;  %v1493_v10 = vpop.f32.mrf.mxu0 }
 0x358   :  { %v1153_v10 = vrot.slane %v1860_v39, %v628_v62  ;;  %v770_v62 = vld [vmem:[#allocation6 + $0x18] sm:$0xff] }
 0x359   :  { %1499 = vmatmul.mubr.msk.bf16.vlgmr.msra.gmra.mxu1 %vm131_vm0, %v632_v9  ;;  %v1642_v9 = vld [vmem:[#allocation4 + $0x1e8] sm:$0xff]  }
 0x35a   :  { %1506 = vmatprep.mubr.msk.bf16.mxu1 %vm1721_vm3, %v1720_v25  ;;  %1503 = vmatpush3.bf16.msra.mxu1 %v1628_v16 }
 0x35b   :  { %1504 = vmatprep.subr.bf16.mxu1 %v1720_v25 }
 0x35e   :  { %1505 = vmatpush3.bf16.msra.mxu1 %v1629_v18 }
 0x35f   :  { %1510 = vmatprep.subr.bf16.mxu1 %v1720_v25 }
 0x371   :  { %v1436_v11 = vpop.f32.mrf.mxu0 }
 0x373   :  { %v1437_v12 = vpop.f32.mrf.mxu0 }
 0x374   :  { %v1438_v13 = vadd.f32 %v1437_v12, %v1436_v11 }
 0x375   :  { %v1439_v14 = vpop.f32.mrf.mxu0 }
 0x376   :  { %v941_v43 = vadd.f32 %v1438_v13, %v809_v41 }
 0x377   :  { %v1440_v15 = vpop.f32.mrf.mxu0 }
 0x378   :  { %v951_v46 = vmul.f32 %v950_v44, %v941_v43  ;;  %vm946_vm11 = vcmp.gt.f32.partialorder %v941_v43, 0.0 }
 0x37a   :  { %v952_v48 = vsel %vm946_vm11, %v941_v43, %v951_v46 }
 0x37b   :  { %v953_v49 = vpack.c.bf16 %v952_v48, %v952_v48 }
 0x419   :  { %v690_v23 = vpop.f32.mrf.mxu1 }
 0x41a   :  { %v691_v24 = vadd.f32 %v690_v23, %v640_v21  ;;  %v1644_v21 = vld [vmem:[#allocation4 + $0x1f8] sm:$0xff]   ;;  %v1224_v23 = vrot.slane %v770_v62, %v1776_v34 }
 0x41b   :  { %v1500_v26 = vpop.f32.mrf.mxu1 }
 0x41c   :  { %vm696_vm10 = vcmp.gt.f32.partialorder %v691_v24, 0.0  ;;  %v701_v27 = vmul.f32 %v700_v22, %v691_v24  ;;  %v1164_v22 = vrot.slane %v1860_v39, %v639_v19 }
 0x41d   :  { %v693_v28 = vpop.f32.mrf.mxu1 }
 0x41e   :  { %v702_v29 = vsel %vm696_vm10, %v691_v24, %v701_v27 }
 0x41f   :  { %v703_v31 = vpack.c.bf16 %v702_v29, %v702_v29  ;;  %v1501_v32 = vpop.f32.mrf.mxu1 }
 0x421   :  { %1507 = vmatmul.mubr.msk.bf16.vlgmr.msra.gmra.mxu1 %vm131_vm0, %v703_v31 }
 0x422   :  { %1511 = vmatpush3.bf16.msra.mxu1 %v1630_v30  ;;  %1526 = vmatprep.mubr.msk.bf16.mxu1 %vm1721_vm3, %v1720_v25 }
 0x423   :  { %1512 = vmatprep.subr.bf16.mxu1 %v1720_v25 }
 0x426   :  { %1513 = vmatpush3.bf16.msra.mxu1 %v1631_v35 }
 0x427   :  { %1514 = vmatprep.subr.bf16.mxu1 %v1720_v25 }
 0x42a   :  { %1515 = vmatpush3.bf16.msra.mxu1 %v1632_v37 }
 0x42b   :  { %1516 = vmatprep.subr.bf16.mxu1 %v1720_v25 }
 0x42e   :  { %1517 = vmatpush3.bf16.msra.mxu1 %v1633_v38 }
 0x42f   :  { %1518 = vmatprep.subr.bf16.mxu1 %v1720_v25 }
 0x432   :  { %1519 = vmatpush3.bf16.msra.mxu1 %v1634_v40 }
 0x433   :  { %1520 = vmatprep.subr.bf16.mxu1 %v1720_v25 }
 0x436   :  { %1521 = vmatpush3.bf16.msra.mxu1 %v1635_v42 }
 0x437   :  { %1522 = vmatprep.subr.bf16.mxu1 %v1720_v25 }
 0x43a   :  { %1523 = vmatpush3.bf16.msra.mxu1 %v1636_v45 }
 0x43b   :  { %1524 = vmatprep.subr.bf16.mxu1 %v1720_v25 }
 0x43e   :  { %1525 = vmatpush3.bf16.msra.mxu1 %v1637_v47 }
 0x43f   :  { %1542 = vmatprep.subr.bf16.mxu1 %v1720_v25 }
 0x441   :  { %1527 = vmatmul.mubr.bf16.vlgmr.msra.gmra.mxu1 %v953_v49 }
 0x442   :  { %1546 = vmatprep.mubr.msk.bf16.mxu1 %vm1721_vm3, %v1720_v25  ;;  %1543 = vmatpush3.bf16.msra.mxu1 %v1642_v9 }
 0x443   :  { %1544 = vmatprep.subr.bf16.mxu1 %v1720_v25 }
 0x446   :  { %1545 = vmatpush3.bf16.msra.mxu1 %v1643_v36 }
 0x447   :  { %1550 = vmatprep.subr.bf16.mxu1 %v1720_v25 }
 0x4e1   :  { %v761_v55 = vpop.f32.mrf.mxu1 }
 0x4e2   :  { %v762_v56 = vadd.f32 %v761_v55, %v711_v54 }
 0x4e3   :  { %v1508_v58 = vpop.f32.mrf.mxu1 }
 0x4e4   :  { %767 = vst [vmem:[%s1914_s5] sm:$0xff] %v762_v56 }
 0x4e5   :  { %v764_v59 = vpop.f32.mrf.mxu1 }
 0x4e7   :  { %v1509_v57 = vpop.f32.mrf.mxu1 }
 0x501   :  { %v1056_v2 = vpop.f32.mrf.mxu1 }
 0x502   :  { %v1057_v3 = vadd.f32 %v1056_v2, %v973_v60 }
 0x503   :  { %v1528_v4 = vpop.f32.mrf.mxu1 }
 0x504   :  { %vm1062_vm12 = vcmp.gt.f32.partialorder %v1057_v3, 0.0  ;;  %v1067_v63 = vmul.f32 %v1066_v1, %v1057_v3 }
 0x505   :  { %v1059_v5 = vpop.f32.mrf.mxu1 }
 0x506   :  { %v1068_v6 = vsel %vm1062_vm12, %v1057_v3, %v1067_v63 }
 0x507   :  { %v1069_v7 = vpack.c.bf16 %v1068_v6, %v1068_v6  ;;  %v1529_v8 = vpop.f32.mrf.mxu1 }
 0x509   :  { %1539 = vmatmul.mubr.msk.bf16.vlgmr.msra.gmra.mxu0 %vm581_vm7, %v1069_v7 }
 0x5c9   :  { %v1143_v11 = vpop.f32.mrf.mxu0 }
 0x5ca   :  { %v1144_v12 = vadd.f32 %v1143_v11, %v1081_v17 }
 0x5cb   :  { %v1540_v13 = vpop.f32.mrf.mxu0 }
 0x5cc   :  { %vm1149_vm13 = vcmp.gt.f32.partialorder %v1144_v12, 0.0  ;;  %v1154_v14 = vmul.f32 %v1153_v10, %v1144_v12 }
 0x5cd   :  { %v1146_v15 = vpop.f32.mrf.mxu0 }
 0x5ce   :  { %v1155_v16 = vsel %vm1149_vm13, %v1144_v12, %v1154_v14 }
 0x5cf   :  { %v1156_v18 = vpack.c.bf16 %v1155_v16, %v1155_v16  ;;  %v1541_v20 = vpop.f32.mrf.mxu0 }
 0x5d1   :  { %1547 = vmatmul.mubr.msk.bf16.vlgmr.msra.gmra.mxu1 %vm131_vm0, %v1156_v18 }
 0x5d2   :  { %1554 = vmatprep.mubr.msk.bf16.mxu1 %vm1721_vm3, %v1720_v25  ;;  %1551 = vmatpush3.bf16.msra.mxu1 %v1644_v21 }
 0x5d3   :  { %1552 = vmatprep.subr.bf16.mxu1 %v1720_v25  ;;  %v1235_v25 = vrot.slane %v1860_v39, %v710_v53 }
 0x5d6   :  { %1553 = vmatpush3.bf16.msra.mxu1 %v1645_v61 }
 0x691   :  { %v1214_v24 = vpop.f32.mrf.mxu1 }
 0x692   :  { %v1215_v26 = vadd.f32 %v1214_v24, %v1164_v22 }
 0x693   :  { %v1548_v27 = vpop.f32.mrf.mxu1 }
 0x694   :  { %vm1220_vm14 = vcmp.gt.f32.partialorder %v1215_v26, 0.0  ;;  %v1225_v28 = vmul.f32 %v1224_v23, %v1215_v26 }
 0x695   :  { %v1217_v29 = vpop.f32.mrf.mxu1 }
 0x696   :  { %v1226_v30 = vsel %vm1220_vm14, %v1215_v26, %v1225_v28 }
 0x697   :  { %v1227_v31 = vpack.c.bf16 %v1226_v30, %v1226_v30  ;;  %v1549_v32 = vpop.f32.mrf.mxu1 }
 0x699   :  { %1555 = vmatmul.mubr.msk.bf16.vlgmr.msra.gmra.mxu1 %vm131_vm0, %v1227_v31 }
 0x759   :  { %v1285_v35 = vpop.f32.mrf.mxu1 }
 0x75a   :  { %v1286_v37 = vadd.f32 %v1285_v35, %v1235_v25 }
 0x75b   :  { %v1556_v33 = vpop.f32.mrf.mxu1 }
 0x75c   :  { %1291 = vst [vmem:[%s1914_s5 + $0x8] sm:$0xff] %v1286_v37 }
 0x75d   :  { %v1288_v34 = vpop.f32.mrf.mxu1 }
 0x75f   :  { %v1557_v19 = vpop.f32.mrf.mxu1 }
 0x760   :  { %1296 = vsyncpa [#allocation3], 1 }
 0x761   :  { %1297 = vsyncpa [#allocation5], 1 }

</bundles_post_ra>
